<compile_context>
chip_gen: v5e
topology: v5e:2x2
jax: 0.10.0
libtpu: 0.0.40
codegen_flags: <defaults>
</compile_context>

<pallas_src>
import functools

import jax
import jax.numpy as jnp
from jax.experimental import pallas as pl
from jax.experimental.pallas import tpu as pltpu


def mlp_kernel(x_ref, w1_ref, b1_ref, w2_ref, b2_ref, o_ref):
    # x_ref : (TB, 64)   VMEM tile of the batch (pipelined across the grid)
    # w1_ref: (64, 128)  VMEM, resident across grid steps
    # b1_ref: (1, 128)   VMEM, resident
    # w2_ref: (1, 128)   VMEM, resident (second-layer weight as a row)
    # b2_ref: (1, 1)     SMEM scalar
    # o_ref : (1, TB)    VMEM -- batch on the lane axis (lane-dense store)

    # Layer 1 on the MXU, fp32 accumulation; bias + ReLU on the VPU.
    h = jnp.dot(x_ref[...], w1_ref[...], preferred_element_type=jnp.float32)
    h = jnp.maximum(h + b1_ref[...], 0.0)                    # (TB, 128), f32

    # Layer 2 (128 -> 1): VPU multiply + XLU cross-lane reduce (avoids an N=1 MXU
    # matmul that would use 1 of 128/256 output columns for almost no work).
    y = jnp.sum(h * w2_ref[...], axis=-1, keepdims=True)     # (TB, 1)
    y = jax.nn.sigmoid(y + b2_ref[0, 0])                     # scalar bias from SMEM (EUP)

    # Lane-dense store: batch goes to the lane axis (cheap XLU transpose of a tiny tile).
    o_ref[...] = jnp.transpose(y).astype(o_ref.dtype)        # (1, TB)


def _round_up(x, m):
    return (x + m - 1) // m * m


@functools.partial(jax.jit, static_argnames=("block_b", "use_bf16_mxu"))
def odevity_forward(x, w1, b1, w2, b2, *, block_b=512, use_bf16_mxu=False):
    """x: (B, 64); w1: (64, 128) [in,out]; b1: (1, 128); w2: (1, 128); b2: (1, 1)."""
    B, F = x.shape
    assert F == 64 and w1.shape == (64, 128) and w2.shape == (1, 128)

    # Batch tiling: pad B to a sublane multiple and cap the tile at `block_b` rows so
    # realistic batches are pipelined (x double-buffered by BlockSpec) while the weights
    # stay VMEM-resident (constant index_maps below).
    TB = min(block_b, _round_up(B, 8))
    B_pad = _round_up(B, TB)
    if B_pad != B:
        x = jnp.pad(x, ((0, B_pad - B), (0, 0)))
    num_tiles = B_pad // TB

    if use_bf16_mxu:
        # v6e/v7x: bf16 MXU operands halve MXU passes and x/w1 DMA bytes; fp32
        # accumulation kept via preferred_element_type.  Relax tolerance to ~1e-2
        # when enabling this (breaks the 1e-5 check in __main__).
        x = x.astype(jnp.bfloat16)
        w1 = w1.astype(jnp.bfloat16)

    out = pl.pallas_call(
        mlp_kernel,
        out_shape=jax.ShapeDtypeStruct((1, B_pad), jnp.float32),
        grid=(num_tiles,),
        in_specs=[
            pl.BlockSpec((TB, 64), lambda i: (i, 0)),            # x tile (pipelined)
            pl.BlockSpec((64, 128), lambda i: (0, 0)),           # w1 (resident)
            pl.BlockSpec((1, 128), lambda i: (0, 0)),            # b1 (resident)
            pl.BlockSpec((1, 128), lambda i: (0, 0)),            # w2 row (resident)
            pl.BlockSpec(memory_space=pltpu.MemorySpace.SMEM),   # b2 scalar
        ],
        out_specs=pl.BlockSpec((1, TB), lambda i: (0, i)),       # lane-dense output
        compiler_params=pltpu.CompilerParams(
            # Batch tiles are independent: shard across v7x's 2 TensorCores;
            # no-op on v5e/v6e.
            dimension_semantics=("parallel",),
        ),
    )(x, w1, b1, w2, b2)

    # Back to the module's (B, 1) output contract.
    return out[0, :B].reshape(B, 1)


def init_params():
    # Deterministic init mimicking PyTorch nn.Linear default
    # (U(-1/sqrt(fan_in), +1/sqrt(fan_in))).
    key = jax.random.PRNGKey(0)
    k1, k2, k3, k4 = jax.random.split(key, 4)
    bound1 = 1.0 / jnp.sqrt(64.0)
    bound2 = 1.0 / jnp.sqrt(128.0)
    w1 = jax.random.uniform(k1, (64, 128), jnp.float32, -bound1, bound1)  # [in, out]
    b1 = jax.random.uniform(k2, (1, 128), jnp.float32, -bound1, bound1)
    w2 = jax.random.uniform(k3, (1, 128), jnp.float32, -bound2, bound2)   # [out=1, in=128]
    b2 = jax.random.uniform(k4, (1, 1), jnp.float32, -bound2, bound2)
    return w1, b1, w2, b2


def _ref(x, w1, b1, w2, b2):
    return jax.nn.sigmoid(jnp.maximum(x @ w1 + b1, 0.0) @ w2.T + b2)


if __name__ == "__main__":
    key = jax.random.PRNGKey(0)
    w1, b1, w2, b2 = init_params()

    # Small-shape check (single tile, no padding): batch=8, features=64.
    x = jax.random.normal(jax.random.fold_in(key, 42), (8, 64), jnp.float32)
    out = jax.block_until_ready(odevity_forward(x, w1, b1, w2, b2))
    assert out.shape == (8, 1)
    assert jnp.allclose(out, _ref(x, w1, b1, w2, b2), atol=1e-5, rtol=1e-5)

    # Multi-tile + padding path check: batch=200 with 128-row tiles (grid=2, 56 pad rows).
    x2 = jax.random.normal(jax.random.fold_in(key, 7), (200, 64), jnp.float32)
    out2 = jax.block_until_ready(odevity_forward(x2, w1, b1, w2, b2, block_b=128))
    assert out2.shape == (200, 1)
    assert jnp.allclose(out2, _ref(x2, w1, b1, w2, b2), atol=1e-5, rtol=1e-5)

    print("KERNEL_OK")
</pallas_src>

<mosaic_0001>
module attributes {stable_mosaic.version = 11 : i64} {
  func.func @mlp_kernel(%arg0: i32, %arg1: memref<8x64xf32, #tpu.memory_space<vmem>>, %arg2: memref<64x128xf32, #tpu.memory_space<vmem>>, %arg3: memref<1x128xf32, #tpu.memory_space<vmem>>, %arg4: memref<1x128xf32, #tpu.memory_space<vmem>>, %arg5: memref<1x1xf32, #tpu.memory_space<smem>>, %arg6: memref<1x8xf32, #tpu.memory_space<vmem>>) attributes {dimension_semantics = [#tpu.dimension_semantics<parallel>], iteration_bounds = array<i64: 1>, scalar_prefetch = 0 : i64, scratch_operands = 0 : i64, tpu.core_type = #tpu.core_type<tc>, window_params = [{transform_indices = @transform_0, window_bounds = array<i64: 8, 64>}, {pipeline_mode = #tpu.pipeline_mode<synchronous>, transform_indices = @transform_1, window_bounds = array<i64: 64, 128>}, {pipeline_mode = #tpu.pipeline_mode<synchronous>, transform_indices = @transform_2, window_bounds = array<i64: 1, 128>}, {pipeline_mode = #tpu.pipeline_mode<synchronous>, transform_indices = @transform_3, window_bounds = array<i64: 1, 128>}, {transform_indices = @transform_4, window_bounds = array<i64: 1, 1>}, {transform_indices = @transform_5, window_bounds = array<i64: 1, 8>}]} {
    %c0 = arith.constant 0 : index
    %c0_0 = arith.constant 0 : index
    %0 = vector.load %arg1[%c0, %c0_0] : memref<8x64xf32, #tpu.memory_space<vmem>>, vector<8x64xf32>
    %c0_1 = arith.constant 0 : index
    %c0_2 = arith.constant 0 : index
    %1 = vector.load %arg2[%c0_1, %c0_2] : memref<64x128xf32, #tpu.memory_space<vmem>>, vector<64x128xf32>
    %cst = arith.constant dense<0.000000e+00> : vector<8x128xf32>
    %2 = tpu.matmul %0, %1, %cst {dimension_numbers = #tpu.dot_dimension_numbers<[1], [0], [0], [1], [0, 0, 1, 1], [], []>} : vector<8x64xf32>, vector<64x128xf32>, vector<8x128xf32> -> vector<8x128xf32>
    %c0_3 = arith.constant 0 : index
    %c0_4 = arith.constant 0 : index
    %3 = vector.load %arg3[%c0_3, %c0_4] : memref<1x128xf32, #tpu.memory_space<vmem>>, vector<1x128xf32>
    %4 = vector.broadcast %3 : vector<1x128xf32> to vector<8x128xf32>
    %5 = arith.addf %2, %4 : vector<8x128xf32>
    %cst_5 = arith.constant 0.000000e+00 : f32
    %6 = vector.broadcast %cst_5 : f32 to vector<8x128xf32>
    %7 = arith.maximumf %5, %6 : vector<8x128xf32>
    %c0_6 = arith.constant 0 : index
    %c0_7 = arith.constant 0 : index
    %8 = vector.load %arg4[%c0_6, %c0_7] : memref<1x128xf32, #tpu.memory_space<vmem>>, vector<1x128xf32>
    %9 = vector.broadcast %8 : vector<1x128xf32> to vector<8x128xf32>
    %10 = arith.mulf %7, %9 : vector<8x128xf32>
    %cst_8 = arith.constant dense<0.000000e+00> : vector<8xf32>
    %11 = vector.multi_reduction <add>, %10, %cst_8 [1] : vector<8x128xf32> to vector<8xf32>
    %12 = vector.shape_cast %11 : vector<8xf32> to vector<8x1xf32>
    %c0_9 = arith.constant 0 : index
    %c0_10 = arith.constant 0 : index
    %13 = memref.load %arg5[%c0_9, %c0_10] : memref<1x1xf32, #tpu.memory_space<smem>>
    %14 = vector.broadcast %13 : f32 to vector<8x1xf32>
    %15 = arith.addf %12, %14 : vector<8x1xf32>
    %16 = arith.negf %15 : vector<8x1xf32>
    %17 = math.exp %16 : vector<8x1xf32>
    %cst_11 = arith.constant 1.000000e+00 : f32
    %18 = vector.broadcast %cst_11 : f32 to vector<8x1xf32>
    %19 = arith.addf %18, %17 : vector<8x1xf32>
    %20 = arith.divf %18, %19 : vector<8x1xf32>
    %21 = tpu.transpose %20, [1, 0] : vector<8x1xf32> -> vector<1x8xf32>
    %c0_12 = arith.constant 0 : index
    %c0_13 = arith.constant 0 : index
    %22 = vector.load %arg6[%c0_12, %c0_13] : memref<1x8xf32, #tpu.memory_space<vmem>>, vector<1x8xf32>
    tpu.vector_store %arg6[%c0_12, %c0_13], %21 {strides = array<i32>} : memref<1x8xf32, #tpu.memory_space<vmem>>, vector<1x8xf32>,
    return
  }
  func.func @transform_0(%arg0: i32) -> (i32, i32) {
    %c0_i32 = arith.constant 0 : i32
    %c0_i32_0 = arith.constant 0 : i32
    return %arg0, %c0_i32 : i32, i32
  }
  func.func @transform_1(%arg0: i32) -> (i32, i32) {
    %c0_i32 = arith.constant 0 : i32
    %c0_i32_0 = arith.constant 0 : i32
    %c0_i32_1 = arith.constant 0 : i32
    return %c0_i32, %c0_i32_0 : i32, i32
  }
  func.func @transform_2(%arg0: i32) -> (i32, i32) {
    %c0_i32 = arith.constant 0 : i32
    %c0_i32_0 = arith.constant 0 : i32
    %c0_i32_1 = arith.constant 0 : i32
    return %c0_i32, %c0_i32_0 : i32, i32
  }
  func.func @transform_3(%arg0: i32) -> (i32, i32) {
    %c0_i32 = arith.constant 0 : i32
    %c0_i32_0 = arith.constant 0 : i32
    %c0_i32_1 = arith.constant 0 : i32
    return %c0_i32, %c0_i32_0 : i32, i32
  }
  func.func @transform_4(%arg0: i32) -> (i32, i32) {
    %c0_i32 = arith.constant 0 : i32
    %c0_i32_0 = arith.constant 0 : i32
    %c0_i32_1 = arith.constant 0 : i32
    return %c0_i32, %c0_i32_0 : i32, i32
  }
  func.func @transform_5(%arg0: i32) -> (i32, i32) {
    %c0_i32 = arith.constant 0 : i32
    %c0_i32_0 = arith.constant 0 : i32
    return %c0_i32, %arg0 : i32, i32
  }
}

</mosaic_0001>

<bundles_post_ra>
// kernel: odevity_forward.1
= control target key start
LH: loop header
LB: loop body
LE: loop exit
PB: predicated region body
PF: predicated region fallthrough
CT: control target
= control target key end

     0   :  { %11 = vsyncpa [#allocation4], 0  ;;  %s316_s0 = inlined_call_operand.hbm [shape: f32[8,64], index: 0, kind: input, shape index: {}]   ;;  %s317_s1 = inlined_call_operand.hbm [shape: f32[64,128], index: 1, kind: input, shape index: {}]   ;;  %s318_s2 = inlined_call_operand.vmem [shape: f32[1,128], index: 2, kind: input, shape index: {}]   ;;  %s319_s3 = inlined_call_operand.vmem [shape: f32[1,128], index: 3, kind: input, shape index: {}]   ;;  %s320_s4 = inlined_call_operand.<no memory space> [shape: f32[1,1], index: 4, kind: input, shape index: {}]   ;;  %s321_s5 = inlined_call_operand.hbm [shape: f32[1,8], index: 5, kind: output, shape index: {}]  }
   0x1   :  { %12 = vsyncpa [#allocation7], 0 }
   0x2   :  { %13 = vsyncpa [#allocation5], 0  ;;  %s19_s20 = sshll.u32 %s316_s0, 4  ;;  %s263_s21 = smov [#allocation3]   ;;  %s20_s20 = int_to_ptr.hbm [resolvable:$true] %s19_s20 }
   0x3   :  { %s21_s22 = sshll.u32 %s263_s21, 4  ;;  %s29_s25 = sshll.u32 %s317_s1, 4  ;;  %s22_s22 = int_to_ptr.vmem [resolvable:$true] %s21_s22  ;;  %s30_s25 = int_to_ptr.hbm [resolvable:$true] %s29_s25 }
   0x4   :  { %24 = dma.hbm_to_vmem [thread:$0]  %s20_s20, 128, %s22_s22, [#allocation4]  }
   0x5   :  { %s264_s26 = smov [#allocation6]   ;;  %s265_s28 = smov 128  }
   0x6   :  { %s31_s27 = sshll.u32 %s264_s26, 4  ;;  %s266_s29 = smov 8   ;;  %s32_s27 = int_to_ptr.vmem [resolvable:$true] %s31_s27 }
   0x7   :  { %37 = dma.hbm_to_vmem [thread:$0]  %s30_s25, 1024, %s32_s27, [#allocation7], %s265_s28, %s265_s28, %s266_s29  }
   0x8   :  { %257 = dma.done.wait [#allocation4], 128  }
   0x9   :  { %258 = vsyncadd [#allocation4], 4294967168 }
   0xa   :  { %259 = dma.done.wait [#allocation7], 1024  }
   0xb   :  { %260 = vsyncadd [#allocation7], 4294966272  ;;  %v60_v0 = vld [vmem:[#allocation6 + $0x38] sm:$0xff]  ;;  %v59_v1 = vld [vmem:[#allocation6 + $0x30] sm:$0xff]  ;;  %vm65_vm0 = vcmask 523264   ;;  %v98_v15 = vstv %s320_s4  ;;  %s160_s10 = sshll.u32 %s321_s5, 4  ;;  %s161_s10 = int_to_ptr.hbm [resolvable:$true] %s160_s10 }
   0xc   :  { %77 = vmatpush.msra.mxu0 %v60_v0  ;;  %v58_v2 = vld [vmem:[#allocation6 + $0x28] sm:$0xff]  ;;  %v57_v3 = vld [vmem:[#allocation6 + $0x20] sm:$0xff]  ;;  %v56_v4 = vld [vmem:[#allocation6 + $0x18] sm:$0xff]  ;;  %vm151_vm5 = vcmask 57344  }
   0xd   :  { %v55_v5 = vld [vmem:[#allocation6 + $0x10] sm:$0xff]  ;;  %v54_v6 = vld [vmem:[#allocation6 + $0x8] sm:$0xff]  ;;  %v53_v7 = vld [vmem:[#allocation6] sm:$0xff] }
   0xe   :  { %78 = vmatpush.msra.mxu0 %v59_v1  ;;  %v52_v8 = vld [vmem:[#allocation3] sm:$0xff] }
   0xf   :  { %v179_v9 = vld [vmem:[%s318_s2] ss:$0 sm:$0xff]  ;;  %s267_s2 = smov [#allocation8]  }
  0x10   :  { %79 = vmatpush.msra.mxu0 %v58_v2  ;;  %v180_v12 = vld [vmem:[%s319_s3] ss:$0 sm:$0xff]  ;;  %s158_s3 = sshll.u32 %s267_s2, 4  ;;  %s159_s3 = int_to_ptr.vmem [resolvable:$true] %s158_s3 }
  0x12   :  { %80 = vmatpush.msra.mxu0 %v57_v3 }
  0x14   :  { %81 = vmatpush.msra.mxu0 %v56_v4 }
  0x16   :  { %82 = vmatpush.msra.mxu0 %v55_v5 }
  0x18   :  { %83 = vmatpush.msra.mxu0 %v54_v6 }
  0x1a   :  { %84 = vmatpush.msra.mxu0 %v53_v7 }
  0x1b   :  { %171 = vmatmul.msk.f32.vlgmr.msra.gmra.mxu0 %vm65_vm0, %v52_v8 }
  0x98   :  { %v86_v10 = vpop.f32.mrf.mxu0 }
  0x99   :  { %v87_v11 = vadd.f32 %v179_v9, %v86_v10 }
  0x9b   :  { %v89_v13 = vmax.f32 %v87_v11, 0.0 }
  0x9d   :  { %v94_v14 = vmul.f32 %v180_v12, %v89_v13 }
  0x9f   :  { %95 = vadd.xlane.f32.xlu0 %v94_v14 }
 0x112   :  { %v96_v16 = vpop.xlane.xlu0 %95 }
 0x113   :  { %v99_v17 = vadd.f32 %v98_v15, %v96_v16 }
 0x115   :  { %v172_v18 = vmul.f32 -1.442695, %v99_v17 }
 0x117   :  { %181 = vpow2.f32 %v172_v18 }
 0x11d   :  { %v182_v19 = vpop.eup %181 }
 0x11e   :  { %v103_v20 = vadd.f32 1.0, %v182_v19 }
 0x120   :  { %183 = vrcp.f32 %v103_v20  ;;  %v115_v24 = vand.u32 2147483648, %v103_v20  ;;  %v113_v26 = vand.u32 2147483647, %v103_v20  ;;  %vm109_vm2 = vweird.f32 %v103_v20 }
 0x122   :  { %v116_v28 = vor.u32 1.1754944e-38, %v115_v24  ;;  %vm114_vm4 = vcmp.eq.f32.partialorder %v113_v26, 8.507059e+37 }
 0x126   :  { %v184_v21 = vpop.eup %183 }
 0x127   :  { %v105_v22 = vmul.f32 %v184_v21, %v103_v20  ;;  %vm110_vm1 = vweird.f32 %v184_v21 }
 0x128   :  { %vm111_vm3 = vmor %vm109_vm2, %vm110_vm1 }
 0x129   :  { %v106_v23 = vsub.f32 1.0, %v105_v22 }
 0x12b   :  { %v107_v25 = vmul.f32 %v184_v21, %v106_v23 }
 0x12d   :  { %v108_v27 = vadd.f32 %v184_v21, %v107_v25 }
 0x12f   :  { %v112_v29 = vsel %vm111_vm3, %v184_v21, %v108_v27 }
 0x130   :  { %v117_v30 = vsel %vm114_vm4, %v116_v28, %v112_v29 }
 0x131   :  { %119 = vxpose.xlu0.b32.start.end [1/1] (short) (narrow) %v117_v30, 8 }
 0x1d5   :  { %v135_v31 = vpop.trf.xlu0 }
 0x1d6   :  { %152 = vst.msk [vmem:[#allocation8] sm:$0x1] %vm151_vm5, %v135_v31 }
 0x1d7   :  { %163 = dma.vmem_to_hbm [thread:$0]  %s159_s3, 16, %s161_s10, [#allocation5]  }
 0x1d8   :  { %261 = dma.done.wait [#allocation5], 16  }
 0x1d9   :  { %262 = vsyncadd [#allocation5], 4294967280 }
 0x1da   :  { %168 = vsyncpa [#allocation4], 1 }
 0x1db   :  { %169 = vsyncpa [#allocation7], 1 }
 0x1dc   :  { %170 = vsyncpa [#allocation5], 1 }

</bundles_post_ra>
